<compile_context>
chip_gen: v5e
topology: v5e:2x2
jax: 0.10.0
libtpu: 0.0.40
codegen_flags: <defaults>
</compile_context>

<pallas_src>
import functools
import math

import jax
import jax.numpy as jnp
import numpy as np
from jax import lax
from jax.experimental import pallas as pl
from jax.experimental.pallas import tpu as pltpu

_MASK_NEG = -1e30           # finite "masked out" bias (avoids inf-inf -> NaN)
_LN2 = math.log(2.0)


# --------------------------------------------------------------------------
# tiling helpers
# --------------------------------------------------------------------------
def _round_up(x, m):
    return ((x + m - 1) // m) * m


def _choose_tile(dim, target, mult):
    """Largest tile that is a multiple of `mult`, <= max(target, mult), and
    divides round_up(dim, mult).  Returns (tile, padded_dim)."""
    padded = _round_up(dim, mult)
    limit = min(max(_round_up(target, mult), mult), padded)
    tile = mult
    for cand in range(mult, limit + 1, mult):
        if padded % cand == 0:
            tile = cand
    return tile, padded


def _pick_block(dim, target, mult):
    """Largest block <= target dividing `dim` and a multiple of `mult`;
    falls back to the full dim (always a legal block shape)."""
    if dim <= target:
        return dim
    b = (target // mult) * mult
    while b >= mult:
        if dim % b == 0:
            return b
        b -= mult
    return dim


def _pick_head_block(n_heads, d_k, d_v):
    """Smallest head fusion whose packed q/k/v/o block lane widths are
    128-multiples; falls back to all heads (block == full packed dim, which is
    always a legal block shape)."""
    for h in range(1, n_heads):
        if n_heads % h == 0 and (h * d_k) % 128 == 0 and (h * d_v) % 128 == 0:
            return h
    return n_heads


# --------------------------------------------------------------------------
# flash attention kernel (plain SDPA or ALiBi, optional mask, packed heads)
# --------------------------------------------------------------------------
def _flash_attn_kernel(*refs, scale, n_heads, h_blk, d_k, d_v, block_k,
                       lk_real, use_alibi, has_mask, pv_dtype):
    if has_mask:
        q_ref, k_ref, v_ref, mask_ref, o_ref, m_scr, l_scr, acc_scr = refs
    else:
        q_ref, k_ref, v_ref, o_ref, m_scr, l_scr, acc_scr = refs
        mask_ref = None

    kv = pl.program_id(3)

    @pl.when(kv == 0)
    def _():
        m_scr[...] = jnp.full_like(m_scr, -jnp.inf)
        l_scr[...] = jnp.zeros_like(l_scr)
        acc_scr[...] = jnp.zeros_like(acc_scr)

    # ---- per-KV-tile additive bias (mask / key padding), shared by heads ----
    key_ids = None
    if use_alibi or (lk_real is not None):
        key_ids = (kv * block_k + lax.broadcasted_iota(
            jnp.int32, (1, block_k), 1)).astype(jnp.float32)      # (1, Tk)
    base_bias = None
    if has_mask:
        # mask streamed as raw integers; bias built here (no f32 HBM stream).
        base_bias = jnp.where(mask_ref[0] == 0, jnp.float32(_MASK_NEG),
                              jnp.float32(0.0))                   # ({1|Tq}, Tk)
    elif lk_real is not None:
        base_bias = jnp.where(key_ids >= float(lk_real),
                              jnp.float32(_MASK_NEG), jnp.float32(0.0))

    head0 = pl.program_id(1) * h_blk

    for hh in range(h_blk):
        # Scale applied to the (Tq, Dk) q tile, not the (Tq, Tk) scores.
        q = q_ref[0, :, hh * d_k:(hh + 1) * d_k] * scale          # (Tq, Dk)
        k = k_ref[0, :, hh * d_k:(hh + 1) * d_k]                  # (Tk, Dk)
        s = lax.dot_general(q, k, (((1,), (1,)), ((), ())),
                            preferred_element_type=jnp.float32)   # (Tq, Tk)

        # ALiBi + mask + padding fused into one bias, one add.
        bias = base_bias
        if use_alibi:
            hid = (head0 + (hh + 1)).astype(jnp.float32)
            slope = jnp.exp(jnp.full((1, 1), -8.0 * _LN2 / n_heads,
                                     jnp.float32) * hid)          # (1, 1)
            alibi = key_ids * slope                               # (1, Tk)
            bias = (bias - alibi) if bias is not None else (-alibi)
        if bias is not None:
            s = s + bias

        # Online softmax update (state per fused head).
        m_prev = m_scr[hh]                                        # (Tq, 1)
        m_new = jnp.maximum(m_prev, jnp.max(s, axis=-1, keepdims=True))
        alpha = jnp.exp(m_prev - m_new)
        p = jnp.exp(s - m_new)
        l_scr[hh] = alpha * l_scr[hh] + jnp.sum(p, axis=-1, keepdims=True)
        v = v_ref[0, :, hh * d_v:(hh + 1) * d_v]                  # (Tk, Dv)
        pv_dt = v.dtype if pv_dtype is None else pv_dtype
        acc_scr[hh] = alpha * acc_scr[hh] + jnp.dot(
            p.astype(pv_dt), v.astype(pv_dt),
            preferred_element_type=jnp.float32)
        m_scr[hh] = m_new

    @pl.when(kv == pl.num_programs(3) - 1)
    def _():
        pieces = []
        for hh in range(h_blk):
            inv = pl.reciprocal(l_scr[hh], approx=True)           # EUP slot
            pieces.append(acc_scr[hh] * inv)                      # (Tq, Dv)
        res = pieces[0] if h_blk == 1 else jnp.concatenate(pieces, axis=-1)
        o_ref[0] = res.astype(o_ref.dtype)      # single lane-dense store


def flash_attention(q, k, v, attn_mask=None, *, n_heads, d_k, d_v,
                    use_alibi=False, scale=None, block_q=256, block_k=512,
                    head_block=None, kv_buffer_count=None, pv_dtype=None,
                    vmem_limit_bytes=None):
    """q: (B, Lq, H*d_k), k: (B, Lk, H*d_k), v: (B, Lk, H*d_v).
    attn_mask: None, (B, Lk), (B, 1, Lk) or (B, Lq, Lk); entries == 0 are
    masked out (torch masked_fill semantics).  Returns (B, Lq, H*d_v)."""
    B, Lq, _ = q.shape
    Lk = k.shape[1]
    scale_factor = (1.0 / math.sqrt(d_k)) if scale is None else scale
    has_mask = attn_mask is not None

    h_blk = head_block if head_block is not None else _pick_head_block(
        n_heads, d_k, d_v)
    assert n_heads % h_blk == 0, "head_block must divide the head count"
    hdk, hdv = h_blk * d_k, h_blk * d_v

    tq, Lq_pad = _choose_tile(Lq, block_q, 8)
    tk, Lk_pad = _choose_tile(Lk, block_k, 128)   # Tk always 128-aligned

    # Pad sequence dims (padded keys are masked below; padded query rows are
    # computed with finite garbage and sliced away).
    if Lq_pad > Lq:
        q = jnp.pad(q, ((0, 0), (0, Lq_pad - Lq), (0, 0)))
    if Lk_pad > Lk:
        k = jnp.pad(k, ((0, 0), (0, Lk_pad - Lk), (0, 0)))
        v = jnp.pad(v, ((0, 0), (0, Lk_pad - Lk), (0, 0)))

    # Optional deeper pipelining of the K/V streams (v5e DMA-hiding knob).
    kv_kwargs = ({"pipeline_mode": pl.Buffered(kv_buffer_count)}
                 if kv_buffer_count else {})

    in_specs = [
        pl.BlockSpec((1, tq, hdk), lambda b, h, qi, ki: (b, qi, h)),
        pl.BlockSpec((1, tk, hdk), lambda b, h, qi, ki: (b, ki, h), **kv_kwargs),
        pl.BlockSpec((1, tk, hdv), lambda b, h, qi, ki: (b, ki, h), **kv_kwargs),
    ]
    inputs = [q, k, v]

    mask_block_elems = 0
    lk_real = None
    if has_mask:
        mask = attn_mask
        if mask.ndim == 2:                                 # (B, Lk) -> (B,1,Lk)
            mask = mask[:, None, :]
        if not jnp.issubdtype(mask.dtype, jnp.integer):
            mask = mask.astype(jnp.int32)
        pad_q = (Lq_pad - Lq) if mask.shape[1] != 1 else 0
        if pad_q or Lk_pad > Lk:
            # zero padding == masked, so padded keys are handled by the mask.
            mask = jnp.pad(mask, ((0, 0), (0, pad_q), (0, Lk_pad - Lk)))
        if mask.shape[1] == 1:
            in_specs.append(
                pl.BlockSpec((1, 1, tk), lambda b, h, qi, ki: (b, 0, ki)))
            mask_block_elems = tk
        else:
            in_specs.append(
                pl.BlockSpec((1, tq, tk), lambda b, h, qi, ki: (b, qi, ki)))
            mask_block_elems = tq * tk
        inputs.append(mask)
    elif Lk_pad > Lk:
        lk_real = Lk            # kernel masks out padded key positions

    out_spec = pl.BlockSpec((1, tq, hdv), lambda b, h, qi, ki: (b, qi, h))
    grid = (B, n_heads // h_blk, Lq_pad // tq, Lk_pad // tk)

    # VMEM budget derived from the actual (double-)buffered block sizes,
    # clamped to <=32 MiB so it is safe on v7x's 64 MiB physical VMEM.
    if vmem_limit_bytes is None:
        isz = q.dtype.itemsize
        kv_bufs = kv_buffer_count or 2
        est = (2 * tq * hdk * isz + kv_bufs * tk * hdk * isz
               + kv_bufs * tk * hdv * isz + 2 * tq * hdv * isz
               + 2 * mask_block_elems * 4
               + 4 * (tq * hdv + 2 * h_blk * tq))
        vmem_limit_bytes = int(min(max(2 * est + (8 << 20), 24 << 20),
                                   32 << 20))

    kernel = functools.partial(
        _flash_attn_kernel, scale=scale_factor, n_heads=n_heads, h_blk=h_blk,
        d_k=d_k, d_v=d_v, block_k=tk, lk_real=lk_real, use_alibi=use_alibi,
        has_mask=has_mask, pv_dtype=pv_dtype)

    out = pl.pallas_call(
        kernel,
        out_shape=jax.ShapeDtypeStruct((B, Lq_pad, n_heads * d_v), q.dtype),
        grid=grid,
        in_specs=in_specs,
        out_specs=out_spec,
        scratch_shapes=[
            pltpu.VMEM((h_blk, tq, 1), jnp.float32),     # running max
            pltpu.VMEM((h_blk, tq, 1), jnp.float32),     # running sum
            pltpu.VMEM((h_blk, tq, d_v), jnp.float32),   # output accumulator
        ],
        compiler_params=pltpu.CompilerParams(
            dimension_semantics=("parallel", "parallel", "parallel",
                                 "arbitrary"),
            vmem_limit_bytes=vmem_limit_bytes,
        ),
    )(*inputs)
    return out[:, :Lq, :] if Lq_pad > Lq else out


# --------------------------------------------------------------------------
# bias-free linear projection kernel (nn.Linear(bias=False)), tiled over M/N/K
# --------------------------------------------------------------------------
def _linear_kernel(x_ref, w_ref, o_ref, acc_ref):
    @pl.when(pl.program_id(2) == 0)
    def _():
        acc_ref[...] = jnp.zeros_like(acc_ref)

    acc_ref[...] += jnp.dot(x_ref[...], w_ref[...],
                            preferred_element_type=jnp.float32)

    @pl.when(pl.program_id(2) == pl.num_programs(2) - 1)
    def _():
        o_ref[...] = acc_ref[...].astype(o_ref.dtype)


def pallas_linear(x, w, *, block_m=256, block_n=512, block_k=512):
    """x: (..., K) @ w: (K, N) -> (..., N), bias-free."""
    *lead, K = x.shape
    N = w.shape[1]
    x2 = x.reshape(-1, K)
    M = x2.shape[0]
    tm = _pick_block(M, block_m, 8)
    tn = _pick_block(N, block_n, 128)
    tkk = _pick_block(K, block_k, 128)
    out = pl.pallas_call(
        _linear_kernel,
        out_shape=jax.ShapeDtypeStruct((M, N), x.dtype),
        grid=(M // tm, N // tn, K // tkk),
        in_specs=[pl.BlockSpec((tm, tkk), lambda i, j, kk: (i, kk)),
                  pl.BlockSpec((tkk, tn), lambda i, j, kk: (kk, j))],
        out_specs=pl.BlockSpec((tm, tn), lambda i, j, kk: (i, j)),
        scratch_shapes=[pltpu.VMEM((tm, tn), jnp.float32)],
        compiler_params=pltpu.CompilerParams(
            dimension_semantics=("parallel", "parallel", "arbitrary")),
    )(x2, w)
    return out.reshape(*lead, N)


# --------------------------------------------------------------------------
# MHAttention forward (no HBM transposes: everything stays head-packed)
# --------------------------------------------------------------------------
def mh_attention(query, key, value, seq_mask, weights, *, t_heads, d_k, d_v,
                 t_dot_product=True, scale=None, **attn_kwargs):
    """Mirrors MHAttention.forward.
    query/key/value: (B, L, d_model); seq_mask: None or (B,Lk)/(B,1,Lk)/(B,Lq,Lk)."""
    q = pallas_linear(query, weights["wq"])   # (B, Lq, H*d_k)
    k = pallas_linear(key, weights["wk"])     # (B, Lk, H*d_k)
    v = pallas_linear(value, weights["wv"])   # (B, Lk, H*d_v)
    attn = flash_attention(q, k, v, attn_mask=seq_mask, n_heads=t_heads,
                           d_k=d_k, d_v=d_v, use_alibi=not t_dot_product,
                           scale=scale, **attn_kwargs)   # (B, Lq, H*d_v)
    return pallas_linear(attn, weights["wo"])


# --------------------------------------------------------------------------
# pure-JAX reference (mirrors the PyTorch module)
# --------------------------------------------------------------------------
def _reference_mha(query, key, value, seq_mask, weights, *, t_heads, d_k, d_v,
                   t_dot_product=True, scale=None):
    B, Lq, _ = query.shape
    Lk = key.shape[1]
    q = (query @ weights["wq"]).reshape(B, Lq, t_heads, d_k).transpose(0, 2, 1, 3)
    k = (key @ weights["wk"]).reshape(B, Lk, t_heads, d_k).transpose(0, 2, 1, 3)
    v = (value @ weights["wv"]).reshape(B, Lk, t_heads, d_v).transpose(0, 2, 1, 3)
    scale_factor = (1.0 / math.sqrt(d_k)) if scale is None else scale
    attn = jnp.einsum("bhqd,bhkd->bhqk", q, k) * scale_factor
    if not t_dot_product:
        slopes = jnp.array(
            [2.0 ** (-8.0 * (i + 1) / t_heads) for i in range(t_heads)],
            dtype=jnp.float32)
        dis = (jnp.arange(Lq)[:, None] - jnp.arange(Lk)[None, :]).astype(jnp.float32)
        attn = attn + dis[None, None] * slopes[None, :, None, None]
    if seq_mask is not None:
        m = seq_mask
        if m.ndim == 2:
            m = m[:, None, :]
        m = m[:, None]                    # unsqueeze(1): broadcast over heads
        attn = jnp.where(m == 0, -jnp.inf, attn)
    p = jax.nn.softmax(attn, axis=-1)
    out = jnp.einsum("bhqk,bhkd->bhqd", p, v)
    out = out.transpose(0, 2, 1, 3).reshape(B, Lq, t_heads * d_v)
    return out @ weights["wo"]


# --------------------------------------------------------------------------
if __name__ == "__main__":
    B, L, d_model, H, d_k, d_v = 2, 8, 32, 4, 16, 16

    root = jax.random.PRNGKey(0)
    keys = jax.random.split(root, 8)
    query = jax.random.normal(keys[0], (B, L, d_model), jnp.float32)
    key = jax.random.normal(keys[1], (B, L, d_model), jnp.float32)
    value = jax.random.normal(keys[2], (B, L, d_model), jnp.float32)
    wscale = 1.0 / math.sqrt(d_model)
    weights = {
        "wq": jax.random.normal(keys[3], (d_model, H * d_k), jnp.float32) * wscale,
        "wk": jax.random.normal(keys[4], (d_model, H * d_k), jnp.float32) * wscale,
        "wv": jax.random.normal(keys[5], (d_model, H * d_v), jnp.float32) * wscale,
        "wo": jax.random.normal(keys[6], (H * d_v, d_model), jnp.float32)
              * (1.0 / math.sqrt(H * d_v)),
    }
    # Padding-style key mask: last two key positions of batch element 1 masked.
    seq_mask = jnp.ones((B, 1, L), jnp.int32).at[1, 0, L - 2:].set(0)

    common = dict(t_heads=H, d_k=d_k, d_v=d_v)

    # 1) Default MHAttention path: plain scaled dot product attention + mask.
    out = jax.block_until_ready(
        mh_attention(query, key, value, seq_mask, weights,
                     t_dot_product=True, **common))
    ref = _reference_mha(query, key, value, seq_mask, weights,
                         t_dot_product=True, **common)
    np.testing.assert_allclose(np.asarray(out), np.asarray(ref),
                               rtol=2e-2, atol=2e-2)

    # 2) ALiBi path (t_dot_product=False) + mask.
    out = jax.block_until_ready(
        mh_attention(query, key, value, seq_mask, weights,
                     t_dot_product=False, **common))
    ref = _reference_mha(query, key, value, seq_mask, weights,
                         t_dot_product=False, **common)
    np.testing.assert_allclose(np.asarray(out), np.asarray(ref),
                               rtol=2e-2, atol=2e-2)

    # 3) ALiBi, no mask, longer non-128-aligned sequence: exercises multi-tile
    #    online softmax (5 q tiles x 2 kv tiles) and the key-padding path.
    L2 = 200
    x2 = jax.random.normal(keys[7], (B, L2, d_model), jnp.float32)
    out = jax.block_until_ready(
        mh_attention(x2, x2, x2, None, weights, t_dot_product=False,
                     block_q=128, block_k=128, **common))
    ref = _reference_mha(x2, x2, x2, None, weights,
                         t_dot_product=False, **common)
    np.testing.assert_allclose(np.asarray(out), np.asarray(ref),
                               rtol=2e-2, atol=2e-2)

    print("KERNEL_OK")
</pallas_src>

<mosaic_0001>
module attributes {stable_mosaic.version = 11 : i64} {
  func.func @_linear_kernel(%arg0: i32, %arg1: i32, %arg2: i32, %arg3: memref<16x32xf32, #tpu.memory_space<vmem>>, %arg4: memref<32x64xf32, #tpu.memory_space<vmem>>, %arg5: memref<16x64xf32, #tpu.memory_space<vmem>>, %arg6: memref<16x64xf32, #tpu.memory_space<vmem>>) attributes {dimension_semantics = [#tpu.dimension_semantics<parallel>, #tpu.dimension_semantics<parallel>, #tpu.dimension_semantics<arbitrary>], iteration_bounds = array<i64: 1, 1, 1>, scalar_prefetch = 0 : i64, scratch_operands = 1 : i64, tpu.core_type = #tpu.core_type<tc>, window_params = [{transform_indices = @transform_0, window_bounds = array<i64: 16, 32>}, {transform_indices = @transform_1, window_bounds = array<i64: 32, 64>}, {transform_indices = @transform_2, window_bounds = array<i64: 16, 64>}]} {
    %c0_i32 = arith.constant 0 : i32
    %0 = arith.cmpi eq, %arg2, %c0_i32 : i32
    %1 = arith.extui %0 : i1 to i32
    %c0_i32_0 = arith.constant 0 : i32
    %2 = arith.cmpi ne, %1, %c0_i32_0 : i32
    scf.if %2 {
      %cst_10 = arith.constant 0.000000e+00 : f32
      %12 = vector.broadcast %cst_10 : f32 to vector<16x64xf32>
      %c0_11 = arith.constant 0 : index
      %c0_12 = arith.constant 0 : index
      %13 = vector.load %arg6[%c0_11, %c0_12] : memref<16x64xf32, #tpu.memory_space<vmem>>, vector<16x64xf32>
      tpu.vector_store %arg6[%c0_11, %c0_12], %12 {strides = array<i32>} : memref<16x64xf32, #tpu.memory_space<vmem>>, vector<16x64xf32>,
    } else {
    }
    %c0 = arith.constant 0 : index
    %c0_1 = arith.constant 0 : index
    %3 = vector.load %arg6[%c0, %c0_1] : memref<16x64xf32, #tpu.memory_space<vmem>>, vector<16x64xf32>
    %c0_2 = arith.constant 0 : index
    %c0_3 = arith.constant 0 : index
    %4 = vector.load %arg3[%c0_2, %c0_3] : memref<16x32xf32, #tpu.memory_space<vmem>>, vector<16x32xf32>
    %c0_4 = arith.constant 0 : index
    %c0_5 = arith.constant 0 : index
    %5 = vector.load %arg4[%c0_4, %c0_5] : memref<32x64xf32, #tpu.memory_space<vmem>>, vector<32x64xf32>
    %cst = arith.constant dense<0.000000e+00> : vector<16x64xf32>
    %6 = tpu.matmul %4, %5, %cst {dimension_numbers = #tpu.dot_dimension_numbers<[1], [0], [0], [1], [0, 0, 1, 1], [], []>} : vector<16x32xf32>, vector<32x64xf32>, vector<16x64xf32> -> vector<16x64xf32>
    %7 = arith.addf %3, %6 : vector<16x64xf32>
    %c0_6 = arith.constant 0 : index
    %c0_7 = arith.constant 0 : index
    %8 = vector.load %arg6[%c0_6, %c0_7] : memref<16x64xf32, #tpu.memory_space<vmem>>, vector<16x64xf32>
    tpu.vector_store %arg6[%c0_6, %c0_7], %7 {strides = array<i32>} : memref<16x64xf32, #tpu.memory_space<vmem>>, vector<16x64xf32>,
    %c0_i32_8 = arith.constant 0 : i32
    %9 = arith.cmpi eq, %arg2, %c0_i32_8 : i32
    %10 = arith.extui %9 : i1 to i32
    %c0_i32_9 = arith.constant 0 : i32
    %11 = arith.cmpi ne, %10, %c0_i32_9 : i32
    scf.if %11 {
      %c0_10 = arith.constant 0 : index
      %c0_11 = arith.constant 0 : index
      %12 = vector.load %arg6[%c0_10, %c0_11] : memref<16x64xf32, #tpu.memory_space<vmem>>, vector<16x64xf32>
      %c0_12 = arith.constant 0 : index
      %c0_13 = arith.constant 0 : index
      %13 = vector.load %arg5[%c0_12, %c0_13] : memref<16x64xf32, #tpu.memory_space<vmem>>, vector<16x64xf32>
      tpu.vector_store %arg5[%c0_12, %c0_13], %12 {strides = array<i32>} : memref<16x64xf32, #tpu.memory_space<vmem>>, vector<16x64xf32>,
    } else {
    }
    return
  }
  func.func @transform_0(%arg0: i32, %arg1: i32, %arg2: i32) -> (i32, i32) {
    %c0_i32 = arith.constant 0 : i32
    return %arg0, %arg2 : i32, i32
  }
  func.func @transform_1(%arg0: i32, %arg1: i32, %arg2: i32) -> (i32, i32) {
    %c0_i32 = arith.constant 0 : i32
    return %arg2, %arg1 : i32, i32
  }
  func.func @transform_2(%arg0: i32, %arg1: i32, %arg2: i32) -> (i32, i32) {
    %c0_i32 = arith.constant 0 : i32
    return %arg0, %arg1 : i32, i32
  }
}

</mosaic_0001>

<bundles_post_ra>
// kernel: tpu_custom_call.1
= control target key start
LH: loop header
LB: loop body
LE: loop exit
PB: predicated region body
PF: predicated region fallthrough
CT: control target
= control target key end

     0   :  { %7 = vsyncpa [#allocation4], 0  ;;  %s256_s0 = inlined_call_operand.hbm [shape: f32[16,32], index: 0, kind: input, shape index: {}]   ;;  %s257_s1 = inlined_call_operand.hbm [shape: f32[32,64], index: 1, kind: input, shape index: {}]   ;;  %s258_s2 = inlined_call_operand.hbm [shape: f32[16,64], index: 2, kind: output, shape index: {}]  }
   0x1   :  { %8 = vsyncpa [#allocation7], 0 }
   0x2   :  { %9 = vsyncpa [#allocation5], 0  ;;  %s14_s11 = sshll.u32 %s256_s0, 4  ;;  %s211_s12 = smov [#allocation3]   ;;  %s15_s11 = int_to_ptr.hbm [resolvable:$true] %s14_s11 }
   0x3   :  { %s16_s13 = sshll.u32 %s211_s12, 4  ;;  %s27_s16 = sshll.u32 %s257_s1, 4  ;;  %s17_s13 = int_to_ptr.vmem [resolvable:$true] %s16_s13  ;;  %s28_s16 = int_to_ptr.hbm [resolvable:$true] %s27_s16 }
   0x4   :  { %s212_s17 = smov 128   ;;  %s213_s18 = smov 8  }
   0x5   :  { %22 = dma.hbm_to_vmem [thread:$0]  %s15_s11, 256, %s17_s13, [#allocation4], %s212_s17, %s212_s17, %s213_s18  }
   0x6   :  { %s214_s19 = smov [#allocation6]  }
   0x7   :  { %s29_s20 = sshll.u32 %s214_s19, 4  ;;  %s30_s20 = int_to_ptr.vmem [resolvable:$true] %s29_s20 }
   0x8   :  { %35 = dma.hbm_to_vmem [thread:$0]  %s28_s16, 512, %s30_s20, [#allocation7], %s212_s17, %s212_s17, %s213_s18  }
   0x9   :  { %205 = dma.done.wait [#allocation4], 256  }
   0xa   :  { %206 = vsyncadd [#allocation4], 4294967040 }
   0xb   :  { %207 = dma.done.wait [#allocation7], 512  }
   0xc   :  { %208 = vsyncadd [#allocation7], 4294966784  ;;  %vm48_vm0 = vcmask 523264   ;;  %v215_v0 = vmov 0.0   ;;  %v58_v1 = vld [vmem:[#allocation6 + $0x18] sm:$0xff]  ;;  %v57_v2 = vld [vmem:[#allocation6 + $0x10] sm:$0xff] }
   0xd   :  { %49 = vst.msk [vmem:[#allocation2] sm:$0xff] %vm48_vm0, %v215_v0  ;;  %78 = vmatpush.msra.mxu0 %v58_v1  ;;  %123 = vmatpush.msra.mxu1 %v58_v1  ;;  %v56_v3 = vld [vmem:[#allocation6 + $0x8] sm:$0xff]  ;;  %v55_v4 = vld [vmem:[#allocation6] sm:$0xff]  ;;  %v53_v5 = vld [vmem:[#allocation3] sm:$0xff]  ;;  %vm59_vm1 = vcmask 261120   ;;  %s216_s0 = smov [#allocation8]  }
   0xe   :  { %50 = vst.msk [vmem:[#allocation2 + $0x8] sm:$0xff] %vm48_vm0, %v215_v0  ;;  %v54_v6 = vld [vmem:[#allocation3 + $0x8] sm:$0xff]  ;;  %s105_s1 = sshll.u32 %s216_s0, 4  ;;  %s107_s23 = sshll.u32 %s258_s2, 4  ;;  %s106_s1 = int_to_ptr.vmem [resolvable:$true] %s105_s1  ;;  %s108_s23 = int_to_ptr.hbm [resolvable:$true] %s107_s23 }
   0xf   :  { %79 = vmatpush.msra.mxu0 %v57_v2  ;;  %124 = vmatpush.msra.mxu1 %v57_v2 }
  0x11   :  { %80 = vmatpush.msra.mxu0 %v56_v3  ;;  %125 = vmatpush.msra.mxu1 %v56_v3 }
  0x13   :  { %81 = vmatpush.msra.mxu0 %v55_v4  ;;  %126 = vmatpush.msra.mxu1 %v55_v4 }
  0x14   :  { %121 = vmatmul.msk.f32.vlgmr.msra.gmra.mxu0 %vm59_vm1, %v53_v5  ;;  %122 = vmatmul.msk.f32.vlgmr.msra.gmra.mxu1 %vm59_vm1, %v54_v6  ;;  %v51_v7 = vld [vmem:[#allocation2] sm:$0xff] }
  0x15   :  { %v52_v8 = vld [vmem:[#allocation2 + $0x8] sm:$0xff] }
  0x91   :  { %v83_v9 = vpop.f32.mrf.mxu0  ;;  %v86_v10 = vpop.f32.mrf.mxu1 }
  0x92   :  { %v89_v11 = vadd.f32 %v83_v9, %v51_v7  ;;  %v90_v12 = vadd.f32 %v86_v10, %v52_v8 }
  0x94   :  { %92 = vst.msk [vmem:[#allocation2] sm:$0xff] %vm48_vm0, %v89_v11 }
  0x95   :  { %93 = vst.msk [vmem:[#allocation2 + $0x8] sm:$0xff] %vm48_vm0, %v90_v12 }
  0x9b   :  { %v97_v13 = vld [vmem:[#allocation2] sm:$0xff] }
  0x9c   :  { %v98_v14 = vld [vmem:[#allocation2 + $0x8] sm:$0xff]  ;;  %99 = vst.msk [vmem:[#allocation8] sm:$0xff] %vm48_vm0, %v97_v13 }
  0x9d   :  { %100 = vst.msk [vmem:[#allocation8 + $0x8] sm:$0xff] %vm48_vm0, %v98_v14 }
  0x9e   :  { %113 = dma.vmem_to_hbm [thread:$0]  %s106_s1, 256, %s108_s23, [#allocation5], %s212_s17, %s212_s17, %s213_s18  }
  0x9f   :  { %209 = dma.done.wait [#allocation5], 256  }
  0xa0   :  { %210 = vsyncadd [#allocation5], 4294967040 }
  0xa1   :  { %118 = vsyncpa [#allocation4], 1 }
  0xa2   :  { %119 = vsyncpa [#allocation7], 1 }
  0xa3   :  { %120 = vsyncpa [#allocation5], 1 }

</bundles_post_ra>
